<compile_context>
chip_gen: v5e
topology: v5e:2x2
jax: 0.10.0
libtpu: 0.0.40
codegen_flags: <defaults>
</compile_context>

<pallas_src>
import jax
import jax.numpy as jnp
from jax.experimental import pallas as pl
from jax.experimental.pallas import tpu as pltpu

_LANE = 128


# ----------------------------------------------------------------------------
# Kernels (transposed layout: features on sublanes, M rows on lanes)
# ----------------------------------------------------------------------------
def _linear_t_kernel(x_ref, w_ref, b_ref, o_ref):
    # x_ref: (F, TM), w_ref: (O, F), b_ref: (O, 1), o_ref: (O, TM)
    acc = jnp.dot(w_ref[...], x_ref[...], preferred_element_type=jnp.float32)
    o_ref[...] = (acc + b_ref[...]).astype(o_ref.dtype)


def _fused_enc_dec_kernel(x_ref, we_ref, be_ref, wd_ref, bd_ref, o_ref):
    # x_ref: (F, TM), we_ref: (H, F), be_ref: (H, 1),
    # wd_ref: (O, H), bd_ref: (O, 1), o_ref: (O, TM)
    h = jnp.dot(we_ref[...], x_ref[...],
                preferred_element_type=jnp.float32) + be_ref[...]
    y = jnp.dot(wd_ref[...], h,
                preferred_element_type=jnp.float32) + bd_ref[...]
    o_ref[...] = y.astype(o_ref.dtype)


# ----------------------------------------------------------------------------
# Tiling / layout helpers (wrapper-side layout plumbing)
# ----------------------------------------------------------------------------
def _round_up(v, m):
    return -(-v // m) * m


def _choose_tile(M, max_tile=1024):
    """Pick a lane-axis tile (multiple of 128) and the padded M."""
    m128 = _round_up(max(M, 1), _LANE)
    if m128 >= 2 * max_tile:
        tile = max_tile
    elif m128 >= 2 * _LANE:
        # keep at least 2 blocks so a 2-TC chip (v7x) can shard the grid
        tile = _round_up(m128 // 2, _LANE)
    else:
        tile = m128
    m_pad = _round_up(m128, tile)
    return tile, m_pad


def _to_lane_major(x):
    """(B, T, N, F) -> (F, M) with M = B*T*N on the (fast) lane axis."""
    B, T, N, F = x.shape
    M = B * T * N
    return jnp.transpose(x.reshape(M, F)), M


def _vmem_limit(nbytes):
    # generous 2x margin, floor 4 MiB, cap 48 MiB (< v7x's 64 MiB physical)
    return int(min(max(2 * nbytes, 4 << 20), 48 << 20))


# ----------------------------------------------------------------------------
# pallas_call wrappers
# ----------------------------------------------------------------------------
def _pointwise_linear_t(x_t, w, b, *, tile_m, m_pad):
    """x_t: (F, M) f32, w: (O, F), b: (O,) -> (O, M)."""
    F, M = x_t.shape
    O = w.shape[0]
    if m_pad != M:
        x_t = jnp.pad(x_t, ((0, 0), (0, m_pad - M)))
    grid = (m_pad // tile_m,)

    flops = 2 * m_pad * F * O
    bytes_accessed = 4 * (m_pad * F + m_pad * O + O * F + O)
    vmem_bytes = 4 * (2 * tile_m * (F + O) + 2 * (O * F + O))

    out = pl.pallas_call(
        _linear_t_kernel,
        out_shape=jax.ShapeDtypeStruct((O, m_pad), x_t.dtype),
        grid_spec=pltpu.PrefetchScalarGridSpec(
            num_scalar_prefetch=0,
            grid=grid,
            in_specs=[
                pl.BlockSpec((F, tile_m), lambda i: (0, i)),
                pl.BlockSpec((O, F), lambda i: (0, 0)),
                pl.BlockSpec((O, 1), lambda i: (0, 0)),
            ],
            out_specs=pl.BlockSpec((O, tile_m), lambda i: (0, i)),
        ),
        compiler_params=pltpu.CompilerParams(
            dimension_semantics=("parallel",),
            vmem_limit_bytes=_vmem_limit(vmem_bytes),
        ),
        cost_estimate=pl.CostEstimate(
            flops=flops, transcendentals=0, bytes_accessed=bytes_accessed),
    )(x_t, w, b.reshape(O, 1))
    return out[:, :M]


def conv1d_layer_forward(x, w, b, *, final_activation=False):
    """Conv1DLayer.forward:  x (B,T,N,F) -> (B,T,N,O).

    w: (O, F)  (PyTorch Conv1d weight (O, F, 1) squeezed), b: (O,).
    """
    B, T, N, F = x.shape
    O = w.shape[0]
    x_t, M = _to_lane_major(x)
    tile_m, m_pad = _choose_tile(M)
    out_t = _pointwise_linear_t(x_t, w, b, tile_m=tile_m, m_pad=m_pad)
    if final_activation:
        out_t = jnp.maximum(out_t, 0.0)  # not used here (final_activation=False)
    return jnp.transpose(out_t).reshape(B, T, N, O)


def fused_enc_dec_forward(x, we, be, wd, bd):
    """Single-kernel enc -> dec (no HBM round-trip for the hidden activations)."""
    B, T, N, F = x.shape
    H = we.shape[0]
    O = wd.shape[0]
    x_t, M = _to_lane_major(x)
    tile_m, m_pad = _choose_tile(M)
    if m_pad != M:
        x_t = jnp.pad(x_t, ((0, 0), (0, m_pad - M)))
    grid = (m_pad // tile_m,)

    flops = 2 * m_pad * (F * H + H * O)
    bytes_accessed = 4 * (m_pad * F + m_pad * O + H * F + H + O * H + O)
    vmem_bytes = 4 * (2 * tile_m * (F + O) + tile_m * H
                      + 2 * (H * F + H + O * H + O))

    out_t = pl.pallas_call(
        _fused_enc_dec_kernel,
        out_shape=jax.ShapeDtypeStruct((O, m_pad), x.dtype),
        grid_spec=pltpu.PrefetchScalarGridSpec(
            num_scalar_prefetch=0,
            grid=grid,
            in_specs=[
                pl.BlockSpec((F, tile_m), lambda i: (0, i)),
                pl.BlockSpec((H, F), lambda i: (0, 0)),
                pl.BlockSpec((H, 1), lambda i: (0, 0)),
                pl.BlockSpec((O, H), lambda i: (0, 0)),
                pl.BlockSpec((O, 1), lambda i: (0, 0)),
            ],
            out_specs=pl.BlockSpec((O, tile_m), lambda i: (0, i)),
        ),
        compiler_params=pltpu.CompilerParams(
            dimension_semantics=("parallel",),
            vmem_limit_bytes=_vmem_limit(vmem_bytes),
        ),
        cost_estimate=pl.CostEstimate(
            flops=flops, transcendentals=0, bytes_accessed=bytes_accessed),
    )(x_t, we, be.reshape(H, 1), wd, bd.reshape(O, 1))
    return jnp.transpose(out_t[:, :M]).reshape(B, T, N, O)


# ----------------------------------------------------------------------------
# Module port
# ----------------------------------------------------------------------------
class SplitNodePredictorClientJAX:
    """Minimal JAX/Pallas port of SplitNodePredictorClient's forward compute."""

    def __init__(self, input_size, hidden_size, output_size, key):
        k1, k2, k3, k4 = jax.random.split(key, 4)
        # PyTorch Conv1d(kernel_size=1) weight shape (out, in, 1) -> store (out, in).
        scale_enc = 1.0 / jnp.sqrt(jnp.float32(input_size))
        scale_dec = 1.0 / jnp.sqrt(jnp.float32(hidden_size))
        self.enc_w = jax.random.uniform(
            k1, (hidden_size, input_size), jnp.float32, -scale_enc, scale_enc)
        self.enc_b = jax.random.uniform(
            k2, (hidden_size,), jnp.float32, -scale_enc, scale_enc)
        self.dec_w = jax.random.uniform(
            k3, (output_size, hidden_size), jnp.float32, -scale_dec, scale_dec)
        self.dec_b = jax.random.uniform(
            k4, (output_size,), jnp.float32, -scale_dec, scale_dec)

    def forward(self, x, stage):
        if stage == 'enc':
            return conv1d_layer_forward(x, self.enc_w, self.enc_b,
                                        final_activation=False)
        elif stage == 'dec':
            return conv1d_layer_forward(x, self.dec_w, self.dec_b,
                                        final_activation=False)
        else:
            raise NotImplementedError()

    def forward_enc_dec(self, x):
        """Fused enc->dec pipeline in a single pallas_call."""
        return fused_enc_dec_forward(x, self.enc_w, self.enc_b,
                                     self.dec_w, self.dec_b)

    __call__ = forward


def _reference_forward(x, w, b):
    # Pure-JAX reference of the Conv1d(kernel_size=1) pointwise linear.
    return jnp.einsum('btnf,of->btno', x, w) + b


if __name__ == "__main__":
    key = jax.random.PRNGKey(0)
    k_param, k_x = jax.random.split(key)

    # Small shapes consistent with the module's forward:
    # x: (batch, ts, n_nodes, feature_dim)
    B, T, N = 2, 8, 16
    input_size, hidden_size, output_size = 4, 32, 2

    client = SplitNodePredictorClientJAX(input_size, hidden_size, output_size,
                                         k_param)

    x = jax.random.normal(k_x, (B, T, N, input_size), dtype=jnp.float32)

    # Stage-wise path (matches module forward(x, stage)).
    h = client(x, stage='enc')           # (B, T, N, hidden_size)
    y_pred = client(h, stage='dec')      # (B, T, N, output_size)
    # Fused single-kernel path (enc -> dec without the HBM intermediate).
    y_fused = client.forward_enc_dec(x)  # (B, T, N, output_size)

    h, y_pred, y_fused = jax.block_until_ready((h, y_pred, y_fused))

    # Correctness check against pure-JAX reference.
    h_ref = _reference_forward(x, client.enc_w, client.enc_b)
    y_ref = _reference_forward(h_ref, client.dec_w, client.dec_b)
    assert h.shape == (B, T, N, hidden_size)
    assert y_pred.shape == (B, T, N, output_size)
    assert y_fused.shape == (B, T, N, output_size)
    assert jnp.allclose(h, h_ref, atol=1e-5, rtol=1e-5)
    assert jnp.allclose(y_pred, y_ref, atol=1e-5, rtol=1e-5)
    assert jnp.allclose(y_fused, y_ref, atol=1e-5, rtol=1e-5)

    print("KERNEL_OK")
</pallas_src>

<mosaic_0001>
module attributes {stable_mosaic.version = 11 : i64} {
  func.func @_linear_t_kernel(%arg0: i32, %arg1: memref<4x128xf32, #tpu.memory_space<vmem>>, %arg2: memref<32x4xf32, #tpu.memory_space<vmem>>, %arg3: memref<32x1xf32, #tpu.memory_space<vmem>>, %arg4: memref<32x128xf32, #tpu.memory_space<vmem>>) attributes {dimension_semantics = [#tpu.dimension_semantics<parallel>], iteration_bounds = array<i64: 2>, scalar_prefetch = 0 : i64, scratch_operands = 0 : i64, tpu.core_type = #tpu.core_type<tc>, window_params = [{transform_indices = @transform_0, window_bounds = array<i64: 4, 128>}, {pipeline_mode = #tpu.pipeline_mode<synchronous>, transform_indices = @transform_1, window_bounds = array<i64: 32, 4>}, {pipeline_mode = #tpu.pipeline_mode<synchronous>, transform_indices = @transform_2, window_bounds = array<i64: 32, 1>}, {transform_indices = @transform_3, window_bounds = array<i64: 32, 128>}]} {
    %c0 = arith.constant 0 : index
    %c0_0 = arith.constant 0 : index
    %0 = vector.load %arg2[%c0, %c0_0] : memref<32x4xf32, #tpu.memory_space<vmem>>, vector<32x4xf32>
    %c0_1 = arith.constant 0 : index
    %c0_2 = arith.constant 0 : index
    %1 = vector.load %arg1[%c0_1, %c0_2] : memref<4x128xf32, #tpu.memory_space<vmem>>, vector<4x128xf32>
    %cst = arith.constant dense<0.000000e+00> : vector<32x128xf32>
    %2 = tpu.matmul %0, %1, %cst {dimension_numbers = #tpu.dot_dimension_numbers<[1], [0], [0], [1], [0, 0, 1, 1], [], []>} : vector<32x4xf32>, vector<4x128xf32>, vector<32x128xf32> -> vector<32x128xf32>
    %c0_3 = arith.constant 0 : index
    %c0_4 = arith.constant 0 : index
    %3 = vector.load %arg3[%c0_3, %c0_4] : memref<32x1xf32, #tpu.memory_space<vmem>>, vector<32x1xf32>
    %4 = vector.broadcast %3 : vector<32x1xf32> to vector<32x128xf32>
    %5 = arith.addf %2, %4 : vector<32x128xf32>
    %c0_5 = arith.constant 0 : index
    %c0_6 = arith.constant 0 : index
    %6 = vector.load %arg4[%c0_5, %c0_6] : memref<32x128xf32, #tpu.memory_space<vmem>>, vector<32x128xf32>
    tpu.vector_store %arg4[%c0_5, %c0_6], %5 {strides = array<i32>} : memref<32x128xf32, #tpu.memory_space<vmem>>, vector<32x128xf32>,
    return
  }
  func.func @transform_0(%arg0: i32) -> (i32, i32) {
    %c0_i32 = arith.constant 0 : i32
    %c0_i32_0 = arith.constant 0 : i32
    return %c0_i32, %arg0 : i32, i32
  }
  func.func @transform_1(%arg0: i32) -> (i32, i32) {
    %c0_i32 = arith.constant 0 : i32
    %c0_i32_0 = arith.constant 0 : i32
    %c0_i32_1 = arith.constant 0 : i32
    return %c0_i32, %c0_i32_0 : i32, i32
  }
  func.func @transform_2(%arg0: i32) -> (i32, i32) {
    %c0_i32 = arith.constant 0 : i32
    %c0_i32_0 = arith.constant 0 : i32
    %c0_i32_1 = arith.constant 0 : i32
    return %c0_i32, %c0_i32_0 : i32, i32
  }
  func.func @transform_3(%arg0: i32) -> (i32, i32) {
    %c0_i32 = arith.constant 0 : i32
    %c0_i32_0 = arith.constant 0 : i32
    return %c0_i32, %arg0 : i32, i32
  }
}

</mosaic_0001>

<bundles_post_ra>
// kernel: tpu_custom_call.1
= control target key start
LH: loop header
LB: loop body
LE: loop exit
PB: predicated region body
PF: predicated region fallthrough
CT: control target
= control target key end

     0   :  { %8 = vsyncpa [#allocation3], 0  ;;  %s582_s0 = inlined_call_operand.vmem [shape: f32[4,256], index: 0, kind: input, shape index: {}]   ;;  %s583_s1 = inlined_call_operand.vmem [shape: f32[32,4], index: 1, kind: input, shape index: {}]   ;;  %s584_s2 = inlined_call_operand.vmem [shape: f32[32,1], index: 2, kind: input, shape index: {}]   ;;  %s585_s3 = inlined_call_operand.hbm [shape: f32[32,256], index: 3, kind: output, shape index: {}]  }
   0x1   :  { %10 = vsyncpa [#allocation3 + $0x1], 0  ;;  %s473_s12 = smov 0   ;;  %s475_s13 = smov 0  }
   0x2   :  { %s477_s14 = smov 0   ;;  %s479_s15 = smov 0  }
   0x3 LB: > { %s494_s16 = sadd.s32 4294967295, %s447_s15   ;;  %s322_s17 = sadd.s32 4294967294, %s447_s15   ;;  %s447_s15 = sphi %s479_s15, %s591_s15   ;;  %s443_s14 = sphi %s477_s14, %s590_s14   ;;  %s439_s13 = sphi %s475_s13, %s589_s13   ;;  %s435_s12 = sphi %s473_s12, %s588_s12  }
   0x4   : > { %s498_s18 = sadd.s32 1, %s447_s15   ;;  %s91_s19 = sadd.s32 1, %s443_s14 }
   0x5   : > { %s88_s20 = ssub.s32 %s447_s15, %s498_s18  ;;  %p101_p0 = scmp.ne.s32.totalorder %s443_s14, %s439_s13 }
   0x6   : > { %p89_p1 = scmp.eq.s32.totalorder %s88_s20, 0  ;;  %p102_p2 = scmp.eq.s32.totalorder %s494_s16, 1 }
   0x7   : > { %p107_p3 = scmp.ne.s32.totalorder %s439_s13, %s435_s12  ;;  %p108_p4 = scmp.eq.s32.totalorder %s322_s17, 1 }
   0x8   : > { %s509_s21 = scalar_select %p89_p1, %s443_s14, %s91_s19  }
   0x9   : > { %p511_p5 = por %p102_p2, %p101_p0  ;;  %p515_p6 = por %p108_p4, %p107_p3 }
   0xa   : > { %p325_p7 = scmp.ge.s32.totalorder %s447_s15, 1  ;;  %p139_p8 = scmp.lt.s32.totalorder %s447_s15, 3 }
   0xc   : > { %p140_p9 = pnand %p325_p7, %p139_p8 }
   0xd   : > { %p162_p10 = scmp.lt.s32.totalorder (!%p140_p9), %s494_s16, 1  ;;  %s159_s27 = sand.u32 (!%p140_p9), 1, %s439_s13  }
   0xe   : > { %143 = sbr.rel (%p140_p9) target bundleno = 167 (0xa7), region = 32  ;;  %s326_s28 = sshll.u32 (!%p140_p9), %s159_s27, 5 }
   0xf   : > { %s161_s6 = scalar_lea.vmem (!%p140_p9), [#allocation2], %s326_s28  ;;  %s405_s19 = scalar_lea.hbm (!%p140_p9), %s585_s3, 64 }
  0x10   : > { %s257_s7 = sshll.u32 (!%p140_p9), %s161_s6, 4  ;;  %s258_s7 = int_to_ptr.vmem [resolvable:$true] %s257_s7 }
  0x13   : > { %v449_v0 = vmov 0   ;;  %v173_v1 = vld [vmem:[%s584_s2 + $0x10] sm:$0xff]  ;;  %s163_s26 = scalar_select %p162_p10, %s494_s16, 1  ;;  %v171_v2 = vld [vmem:[%s584_s2] sm:$0xff]  ;;  %vm208_vm0 = vcmask 1043456   ;;  %vm195_vm1 = vcmask 31744  }
  0x14   : > { %384 = vset.pattern.permute.xlu1 %v449_v0  ;;  %383 = vset.pattern.permute.xlu0 %v449_v0  ;;  %v166_v4 = vld [vmem:[%s583_s1] sm:$0xff]  ;;  %v167_v5 = vld [vmem:[%s583_s1 + $0x8] sm:$0xff]  ;;  %v168_v6 = vld [vmem:[%s583_s1 + $0x10] sm:$0xff] }
  0x15   : > { %187 = vperm.xlu1 %384, %v173_v1   ;;  %177 = vperm.xlu0 %383, %v171_v2   ;;  %s327_s29 = sshll.u32 %s163_s26, 2  ;;  %v169_v7 = vld [vmem:[%s583_s1 + $0x18] sm:$0xff]  ;;  %v172_v9 = vld [vmem:[%s584_s2 + $0x8] sm:$0xff] }
  0x16   : > { %s165_s5 = scalar_lea.vmem %s582_s0, %s327_s29  ;;  %v174_v8 = vld [vmem:[%s584_s2 + $0x18] sm:$0xff]  ;;  %s334_s29 = sshll.u32 %s494_s16, 3 }
  0x17   : > { %v170_v3 = vld [vmem:[%s165_s5] sm:$0xf]  ;;  %s256_s5 = scalar_lea.hbm %s585_s3, %s334_s29  ;;  %s246_s16 = scalar_lea.sflag [#allocation3], %s159_s27 }
  0x18   : > { %328 = vmatpush.msk.msra.mxu0 %vm208_vm0, %v170_v3  ;;  %337 = vmatpush.msk.msra.mxu1 %vm208_vm0, %v170_v3  ;;  %s259_s8 = sshll.u32 %s256_s5, 4  ;;  %s260_s8 = int_to_ptr.hbm [resolvable:$true] %s259_s8 }
  0x19   : > { %338 = vmatpush.msk.msra.mxu2 %vm208_vm0, %v170_v3  ;;  %339 = vmatpush.msk.msra.mxu3 %vm208_vm0, %v170_v3  ;;  %s399_s9 = sshra.s32 %s260_s8, 4  ;;  %s400_s9 = int_to_ptr.hbm [resolvable:$true] %s399_s9 }
  0x1a   : > { %329 = vmatmul.msk.f32.vlgmr.msra.gmra.mxu0 %vm195_vm1, %v166_v4  ;;  %330 = vmatmul.msk.f32.vlgmr.msra.gmra.mxu1 %vm195_vm1, %v167_v5  ;;  %s401_s10 = scalar_lea.hbm %s400_s9, 32  ;;  %p406_p0 = scmp.lt.s32.totalorder %s400_s9, %s585_s3 }
  0x1b   : > { %331 = vmatmul.msk.f32.vlgmr.msra.gmra.mxu2 %vm195_vm1, %v168_v6  ;;  %332 = vmatmul.msk.f32.vlgmr.msra.gmra.mxu3 %vm195_vm1, %v169_v7  ;;  %p402_p11 = scmp.ne.s32.totalorder %s400_s9, %s401_s10  ;;  %p407_p1 = scmp.lt.s32.totalorder %s405_s19, %s401_s10 }
  0x1d   : > { %192 = vperm.xlu1 %384, %v174_v8   ;;  %182 = vperm.xlu0 %383, %v172_v9   ;;  %p403_p12 = pnand %p402_p11, %p511_p5  ;;  %p408_p2 = por %p407_p1, %p406_p0 }
  0x1f   : > { %p404_p13 = pneg %p403_p12 }
  0x21   : > { %p409_p3 = pnand %p408_p2, %p404_p13 }
  0x87   : > { %v178_v10 = vpop.permute.xlu0 %177  ;;  %v188_v11 = vpop.permute.xlu1 %187 }
  0x8f   : > { %v183_v12 = vpop.permute.xlu0 %182  ;;  %v193_v17 = vpop.permute.xlu1 %192 }
  0x97   : > { %v229_v13 = vpop.f32.mrf.mxu0  ;;  %v232_v14 = vpop.f32.mrf.mxu1 }
  0x98   : > { %v230_v15 = vadd.f32 %v229_v13, %v178_v10  ;;  %v233_v16 = vadd.f32 %v232_v14, %v183_v12 }
  0x9a   : > { %241 = vst [vmem:[%s161_s6] sm:$0xff] %v230_v15 }
  0x9b   : > { %242 = vst [vmem:[%s161_s6 + $0x8] sm:$0xff] %v233_v16 }
  0x9e   : > { %v235_v18 = vpop.f32.mrf.mxu2  ;;  %v238_v19 = vpop.f32.mrf.mxu3 }
  0x9f   : > { %v236_v20 = vadd.f32 %v235_v18, %v188_v11  ;;  %v239_v21 = vadd.f32 %v238_v19, %v193_v17 }
  0xa1   : > { %243 = vst [vmem:[%s161_s6 + $0x10] sm:$0xff] %v236_v20 }
  0xa2   : > { %244 = vst [vmem:[%s161_s6 + $0x18] sm:$0xff] %v239_v21 }
  0xa3   : > { %412 = shalt.err (!%p409_p3)
}
  0xa4   : > { %s450_s25 = smov 128   ;;  %s451_s26 = smov 256  }
  0xa5   : > { %s452_s27 = smov 8  }
  0xa6   : > { %340 = dma.vmem_to_hbm [thread:$0]  (%p511_p5), %s258_s7, 512, %s260_s8, %s246_s16, %s450_s25, %s451_s26, %s452_s27  }
  0xa7 PF: > { %p346_p4 = scmp.ge.s32.totalorder %s447_s15, 2  ;;  %s274_s28 = sand.u32 1, %s435_s12  }
  0xa8   : > { %s275_s29 = scalar_lea.sflag [#allocation3], %s274_s28 }
  0xa9   : > { %p343_p7 = pnand %p346_p4, %p515_p6 }
  0xab   : > { %p344_p8 = pneg %p343_p7 }
  0xad   : > { %430 = dma.done.wait (%p344_p8), %s275_s29, 512  }
  0xae   : > { %432 = vsyncadd (%p344_p8), %s275_s29, 4294966784  ;;  %p13_p9 = scmp.ge.s32.totalorder %s498_s18, 4   ;;  %s588_s12 = smov %s439_s13 }
  0xaf   : > { %s589_s13 = smov %s443_s14  ;;  %s590_s14 = smov %s509_s21 }
  0xb0   : > { %s591_s15 = smov %s498_s18  ;;  %15 = sbr.rel (!%p13_p9) target bundleno = 3 (0x3), region = 67 }
  0xb5   :  { %281 = vsyncpa [#allocation3], 1 }
  0xb6   :  { %283 = vsyncpa [#allocation3 + $0x1], 1 }

</bundles_post_ra>
